<compile_context>
chip_gen: v7x
topology: tpu7x:2x2x1
jax: 0.10.0
libtpu: 0.0.40
codegen_flags: <defaults>
</compile_context>

<pallas_src>
import math
import functools
import numpy as np
import jax
import jax.numpy as jnp
from jax.experimental import pallas as pl
from jax.experimental.pallas import tpu as pltpu

F32 = jnp.float32
BIG = 1e30
NEG = -1e30

# ----------------------------- config (small synthetic shapes) ---------------
IDIM = 20          # input feature dim
ADIM = 32          # transformer attention dim
AHEADS = 4         # attention heads
EUNITS = 64        # FFN units
ELAYERS = 2        # encoder layers
ODIM = 11          # output vocab (last id = sos/eos)
DUNITS = 32        # decoder LSTM units
ATT_DIM = 32       # decoder dot-attention dim
MTLALPHA = 0.5
SOS = EOS = ODIM - 1
IGNORE_ID = -1
BLANK = 0

VMEM = pl.BlockSpec(memory_space=pltpu.MemorySpace.VMEM)

# ----------------------------- small helper kernels ---------------------------

def _linear_kernel(act, x_ref, w_ref, b_ref, o_ref):
    y = jnp.dot(x_ref[...], w_ref[...], preferred_element_type=jnp.float32) + b_ref[...]
    if act == "relu":
        y = jnp.maximum(y, 0.0)
    o_ref[...] = y


def linear(x, w, b, act=None):
    # x: (M, K) f32, w: (K, N), b: (1, N)
    M = x.shape[0]
    N = w.shape[1]
    return pl.pallas_call(
        functools.partial(_linear_kernel, act),
        out_shape=jax.ShapeDtypeStruct((M, N), F32),
        in_specs=[VMEM, VMEM, VMEM],
        out_specs=VMEM,
    )(x, w, b)


def _ln(x, g, b):
    mean = jnp.mean(x, axis=-1, keepdims=True)
    var = jnp.mean(jnp.square(x - mean), axis=-1, keepdims=True)
    return (x - mean) * jax.lax.rsqrt(var + 1e-12) * g + b

# ----------------------------- fused encoder + CTC kernel ---------------------

def _encoder_kernel(B, T2, H, DK, nlayers,
                    h_ref, pe_ref, maskv_ref, sub_w_ref, sub_b_ref,
                    qkv_w_ref, qkv_b_ref, ow_ref, ob_ref,
                    w1_ref, b1_ref, w2_ref, b2_ref,
                    ln1g_ref, ln1b_ref, ln2g_ref, ln2b_ref,
                    afterg_ref, afterb_ref, ctcw_ref, ctcb_ref,
                    hs_ref, ctc_ref):
    D = H * DK
    M = B * T2
    inv_sqrt = 1.0 / math.sqrt(DK)

    # --- input layer: subsampling linear + sqrt(d) scale + positional encoding ---
    x = (jnp.dot(h_ref[...], sub_w_ref[...], preferred_element_type=jnp.float32)
         + sub_b_ref[...]) * math.sqrt(D) + pe_ref[...]

    # --- hoisted attention masks (shared by every layer) ---
    maskv = maskv_ref[...]                    # (H*M, H*M) 0/1 block-diag + key mask
    mask_add = (maskv - 1.0) * BIG            # additive: 0 where valid, -1e30 elsewhere

    def head_stack(a):
        # (M, D) -> (H*M, DK); rows ordered (head, batch, time)
        return jnp.concatenate([a[:, hh * DK:(hh + 1) * DK] for hh in range(H)], axis=0)

    def head_unstack(a):
        # (H*M, DK) -> (M, D); heads back onto the lane axis
        return jnp.concatenate([a[hh * M:(hh + 1) * M, :] for hh in range(H)], axis=1)

    for l in range(nlayers):
        # --- self-attention sublayer (normalize_before=True) ---
        xn = _ln(x, ln1g_ref[l], ln1b_ref[l])
        qkv = jnp.dot(xn, qkv_w_ref[l], preferred_element_type=jnp.float32) + qkv_b_ref[l]
        q = head_stack(qkv[:, 0:D])
        k = head_stack(qkv[:, D:2 * D])
        v = head_stack(qkv[:, 2 * D:3 * D])
        s = jax.lax.dot_general(q, k, (((1,), (1,)), ((), ())),
                                preferred_element_type=jnp.float32) * inv_sqrt
        s = s + mask_add
        s = s - jnp.max(s, axis=-1, keepdims=True)
        p = jnp.exp(s)
        p = p * pl.reciprocal(jnp.sum(p, axis=-1, keepdims=True), approx=True)
        p = p * maskv                                  # masked_fill of p_attn (ESPnet)
        ctx = jnp.dot(p, v, preferred_element_type=jnp.float32)
        att = head_unstack(ctx)
        x = x + jnp.dot(att, ow_ref[l], preferred_element_type=jnp.float32) + ob_ref[l]
        # --- feed-forward sublayer ---
        xn2 = _ln(x, ln2g_ref[l], ln2b_ref[l])
        mid = jnp.maximum(
            jnp.dot(xn2, w1_ref[l], preferred_element_type=jnp.float32) + b1_ref[l], 0.0)
        x = x + jnp.dot(mid, w2_ref[l], preferred_element_type=jnp.float32) + b2_ref[l]

    x = _ln(x, afterg_ref[...], afterb_ref[...])       # after_norm
    hs_ref[...] = x
    # --- CTC projection + log-softmax (fused) ---
    y = jnp.dot(x, ctcw_ref[...], preferred_element_type=jnp.float32) + ctcb_ref[...]
    y = y - jnp.max(y, axis=-1, keepdims=True)
    ctc_ref[...] = y - jnp.log(jnp.sum(jnp.exp(y), axis=-1, keepdims=True))

# ----------------------------- conv front-end (im2col in JAX) -----------------

def conv2d_relu(x, w2d, b, stride=2, k=3):
    # TODO(synk): im2col patch extraction stays in plain JAX; the matmul+relu is Pallas.
    B, Cin, H, W = x.shape
    Cout = w2d.shape[1]
    Ho = (H - k) // stride + 1
    Wo = (W - k) // stride + 1
    patches = []
    for i in range(k):
        for j in range(k):
            patches.append(x[:, :, i:i + stride * (Ho - 1) + 1:stride,
                              j:j + stride * (Wo - 1) + 1:stride])
    p_ = jnp.stack(patches, axis=2)                         # (B, Cin, k*k, Ho, Wo)
    p_ = p_.transpose(0, 3, 4, 1, 2).reshape(B * Ho * Wo, Cin * k * k)
    y = linear(p_, w2d, b, act="relu")                      # Pallas matmul + relu
    return y.reshape(B, Ho, Wo, Cout).transpose(0, 3, 1, 2)


def positional_encoding(T, d):
    pe = np.zeros((T, d), dtype=np.float32)
    position = np.arange(T, dtype=np.float32)[:, None]
    div_term = np.exp(np.arange(0, d, 2, dtype=np.float32) * -(math.log(10000.0) / d))
    pe[:, 0::2] = np.sin(position * div_term)
    pe[:, 1::2] = np.cos(position * div_term)
    return jnp.asarray(pe)


def encoder_ctc(p, xs_pad, src_mask):
    # TODO(synk): chunked/memory Encoder variants (center/left/right chunk len, use_mem)
    # are not modeled; defaults here give the standard full-context encoder.
    B, T, _ = xs_pad.shape
    h = conv2d_relu(xs_pad[:, None, :, :], p["conv1_w2d"], p["conv1_b"])
    h = conv2d_relu(h, p["conv2_w2d"], p["conv2_b"])
    _, C, T2, F2 = h.shape
    h2 = h.transpose(0, 2, 1, 3).reshape(B * T2, C * F2)    # (b,t,c*f) like x.transpose(1,2)
    M = B * T2

    pe_tiled = jnp.tile(positional_encoding(T2, ADIM), (B, 1))          # (M, ADIM)

    hs_mask = src_mask[:, :, :-2:2][:, :, :-2:2]            # (B, 1, T2)
    mask_f = hs_mask[:, 0, :].astype(F32)                   # (B, T2)

    # block-diagonal (head, batch) attention mask with key padding, built once
    HM = AHEADS * M
    r = jnp.arange(HM)
    head_id = r // M
    bat_id = (r % M) // T2
    same_block = (head_id[:, None] == head_id[None, :]) & (bat_id[:, None] == bat_id[None, :])
    key_valid = jnp.tile(mask_f.reshape(-1), (AHEADS,))     # (HM,)
    maskv = (same_block & (key_valid[None, :] > 0.5)).astype(F32)       # (HM, HM)

    hs_flat, ctc_lp = pl.pallas_call(
        functools.partial(_encoder_kernel, B, T2, AHEADS, ADIM // AHEADS, ELAYERS),
        out_shape=(jax.ShapeDtypeStruct((M, ADIM), F32),
                   jax.ShapeDtypeStruct((M, ODIM), F32)),
        in_specs=[VMEM] * 21,
        out_specs=(VMEM, VMEM),
    )(h2, pe_tiled, maskv, p["sub_w"], p["sub_b"],
      p["qkv_w"], p["qkv_b"], p["o_w"], p["o_b"],
      p["ff_w1"], p["ff_b1"], p["ff_w2"], p["ff_b2"],
      p["ln1_g"], p["ln1_b"], p["ln2_g"], p["ln2_b"],
      p["after_g"], p["after_b"], p["ctc_w"], p["ctc_b"])

    return hs_flat.reshape(B, T2, ADIM), ctc_lp.reshape(B, T2, ODIM), hs_mask

# ----------------------------- fused LSTM attention decoder kernel ------------

def _decoder_kernel(B, T2, U, OD, olength,
                    hs_ref, dvalid_ref, eys_ref,
                    encw_ref, encb_ref, dw_ref, db_ref,
                    wih_ref, whh_ref, lb_ref, ow_ref, ob_ref,
                    logp_ref):
    M = B * T2
    hs = hs_ref[...]                                        # (M, ADIM)
    # AttDot enc projection folded in; ESPnet scaling=2.0 folded into pre
    pre = jnp.tanh(jnp.dot(hs, encw_ref[...], preferred_element_type=jnp.float32)
                   + encb_ref[...]) * 2.0                   # (M, ATT_DIM)
    dvalid = dvalid_ref[...]                                # (B, M) 0/1 block + key mask
    dmask_add = (dvalid - 1.0) * BIG
    dw = dw_ref[...]
    db = db_ref[...]
    wih = wih_ref[...]                                      # (U + ADIM, 4U), g-cols pre-scaled x2
    wih_e = wih[0:U, :]
    wih_c = wih[U:, :]
    whh = whh_ref[...]
    lb = lb_ref[...]
    ow = ow_ref[...]
    ob = ob_ref[...]
    # gate order (PyTorch LSTMCell): i, f, g, o
    gidx = jax.lax.broadcasted_iota(jnp.int32, (B, 4 * U), 1) // U
    is_g = gidx == 2

    def step(i, carry):
        z, c = carry
        # dot-attention with dec state from *before* this step's LSTM update
        dec_t = jnp.tanh(jnp.dot(z, dw, preferred_element_type=jnp.float32) + db)   # (B, A)
        e = jax.lax.dot_general(dec_t, pre, (((1,), (1,)), ((), ())),
                                preferred_element_type=jnp.float32)                 # (B, M)
        e = e + dmask_add
        e = e - jnp.max(e, axis=1, keepdims=True)
        w = jnp.exp(e)
        w = w * pl.reciprocal(jnp.sum(w, axis=1, keepdims=True), approx=True)
        w = w * dvalid
        att_c = jnp.dot(w, hs, preferred_element_type=jnp.float32)                  # (B, ADIM)
        # LSTMCell on [embedding ; context] without materializing the concat
        row = pl.multiple_of(i * B, B)
        ey = eys_ref[pl.ds(row, B), :]                                               # (B, U)
        gates = (jnp.dot(ey, wih_e, preferred_element_type=jnp.float32)
                 + jnp.dot(att_c, wih_c, preferred_element_type=jnp.float32)
                 + jnp.dot(z, whh, preferred_element_type=jnp.float32) + lb)         # (B, 4U)
        # g-gate weight columns were pre-scaled by 2 at init: tanh(x) = 2*sigmoid(2x)-1,
        # so a single sigmoid covers all four gates (one EUP transcendental saved/step).
        sig = jax.nn.sigmoid(gates)
        act = jnp.where(is_g, 2.0 * sig - 1.0, sig)
        i_g = act[:, 0:U]
        f_g = act[:, U:2 * U]
        g_g = act[:, 2 * U:3 * U]
        o_g = act[:, 3 * U:4 * U]
        c_new = f_g * c + i_g * g_g
        z_new = o_g * jnp.tanh(c_new)
        # output projection + log-softmax, stored into the flattened (olength*B, OD) output
        y = jnp.dot(z_new, ow, preferred_element_type=jnp.float32) + ob              # (B, OD)
        y = y - jnp.max(y, axis=-1, keepdims=True)
        logp_ref[pl.ds(row, B), :] = y - jnp.log(jnp.sum(jnp.exp(y), axis=-1, keepdims=True))
        return z_new, c_new

    z0 = jnp.zeros((B, U), jnp.float32)
    c0 = jnp.zeros((B, U), jnp.float32)
    jax.lax.fori_loop(0, olength, step, (z0, c0),
                      unroll=True if olength <= 8 else 2)


def decoder(p, hs_pad, hlens, ys_pad):
    B, T2, _ = hs_pad.shape
    M = B * T2
    L = ys_pad.shape[1]
    olens = jnp.sum(ys_pad != IGNORE_ID, axis=1)
    olength = L + 1

    ys_in = jnp.concatenate(
        [jnp.full((B, 1), SOS, jnp.int32), jnp.where(ys_pad == IGNORE_ID, EOS, ys_pad)], axis=1)
    pos = jnp.arange(olength)[None, :]
    ys_padded = jnp.pad(ys_pad, ((0, 0), (0, 1)), constant_values=0)
    ys_out = jnp.where(pos < olens[:, None], ys_padded,
                       jnp.where(pos == olens[:, None], EOS, IGNORE_ID))

    # TODO(synk): embedding gather stays in JAX; at real vocab sizes pass ids via SMEM
    # scalar prefetch and gather rows in-kernel instead.
    eys = p["embed"][ys_in].transpose(1, 0, 2).reshape(olength * B, DUNITS)

    # hoisted decoder attention mask (batch-block + key padding), (B, B*T2)
    att_mask = (jnp.arange(T2)[None, :] < hlens[:, None]).astype(F32)     # (B, T2)
    bid = jnp.arange(M) // T2
    dvalid = ((jnp.arange(B)[:, None] == bid[None, :])
              & (att_mask.reshape(-1)[None, :] > 0.5)).astype(F32)        # (B, M)

    hs_flat = hs_pad.reshape(M, ADIM)

    logp = pl.pallas_call(
        functools.partial(_decoder_kernel, B, T2, DUNITS, ODIM, olength),
        out_shape=jax.ShapeDtypeStruct((olength * B, ODIM), F32),
        in_specs=[VMEM] * 12,
        out_specs=VMEM,
    )(hs_flat, dvalid, eys, p["att_enc_w"], p["att_enc_b"],
      p["att_dec_w"], p["att_dec_b"],
      p["lstm_wih"], p["lstm_whh"], p["lstm_b"], p["out_w"], p["out_b"])

    logp_bo = logp.reshape(olength, B, ODIM).transpose(1, 0, 2)           # (B, olength, ODIM)
    logp2 = logp_bo.reshape(B * olength, ODIM)
    ys_out_f = ys_out.reshape(-1)
    valid = ys_out_f != IGNORE_ID
    tgt = jnp.where(valid, ys_out_f, 0)
    nll = -jnp.take_along_axis(logp2, tgt[:, None], axis=1)[:, 0]
    ce = jnp.sum(jnp.where(valid, nll, 0.0)) / jnp.sum(valid)
    loss_att = ce * jnp.mean(olens.astype(F32))           # *= mean(len(ys_in)) - 1

    pad_pred = jnp.argmax(logp_bo, axis=2)
    mask = ys_out != IGNORE_ID
    acc = jnp.sum((pad_pred == ys_out) & mask).astype(F32) / jnp.sum(mask)
    return loss_att, acc

# ----------------------------- parameter init ---------------------------------

def init_params(key):
    keys = list(jax.random.split(key, 64))
    it = iter(keys)

    def nrm(shape, std):
        return (std * jax.random.normal(next(it), shape)).astype(F32)

    def zeros(shape):
        return jnp.zeros(shape, F32)

    def ones(shape):
        return jnp.ones(shape, F32)

    f2 = ((IDIM - 1) // 2 - 1) // 2
    conv1_w = nrm((ADIM, 1, 3, 3), 1.0 / math.sqrt(1 * 9))
    conv2_w = nrm((ADIM, ADIM, 3, 3), 1.0 / math.sqrt(ADIM * 9))
    p = {
        # conv weights pre-flattened to (Cin*k*k, Cout) at init (matches im2col order)
        "conv1_w2d": conv1_w.reshape(ADIM, 1 * 9).T, "conv1_b": zeros((1, ADIM)),
        "conv2_w2d": conv2_w.reshape(ADIM, ADIM * 9).T, "conv2_b": zeros((1, ADIM)),
        "sub_w": nrm((ADIM * f2, ADIM), 1.0 / math.sqrt(ADIM * f2)), "sub_b": zeros((1, ADIM)),
        "after_g": ones((1, ADIM)), "after_b": zeros((1, ADIM)),
        "ctc_w": nrm((ADIM, ODIM), 1.0 / math.sqrt(ADIM)), "ctc_b": zeros((1, ODIM)),
        "embed": nrm((ODIM, DUNITS), 1.0),                     # EmbedID.W ~ N(0,1)
        "att_enc_w": nrm((ADIM, ATT_DIM), 1.0 / math.sqrt(ADIM)), "att_enc_b": zeros((1, ATT_DIM)),
        "att_dec_w": nrm((DUNITS, ATT_DIM), 1.0 / math.sqrt(DUNITS)), "att_dec_b": zeros((1, ATT_DIM)),
        "out_w": nrm((DUNITS, ODIM), 1.0 / math.sqrt(DUNITS)), "out_b": zeros((1, ODIM)),
    }
    ein = DUNITS + ADIM
    wih = nrm((ein, 4 * DUNITS), 1.0 / math.sqrt(ein))
    whh = nrm((DUNITS, 4 * DUNITS), 1.0 / math.sqrt(DUNITS))
    # set_forget_bias_to_one: bias_ih[U:2U] = 1
    lb = jnp.zeros((1, 4 * DUNITS), F32).at[0, DUNITS:2 * DUNITS].set(1.0)
    # Reparameterize g-gate (cell-input) columns by x2 so the decoder kernel uses a
    # single sigmoid over all gates (tanh(x) = 2*sigmoid(2x) - 1). Forward unchanged.
    gscale = jnp.ones((1, 4 * DUNITS), F32).at[0, 2 * DUNITS:3 * DUNITS].set(2.0)
    p["lstm_wih"] = wih * gscale
    p["lstm_whh"] = whh * gscale
    p["lstm_b"] = lb * gscale

    # encoder layer weights stacked along a leading layer axis (single fused kernel)
    s = 1.0 / math.sqrt(ADIM)
    p["qkv_w"] = jnp.stack([nrm((ADIM, 3 * ADIM), s) for _ in range(ELAYERS)])
    p["qkv_b"] = jnp.zeros((ELAYERS, 1, 3 * ADIM), F32)
    p["o_w"] = jnp.stack([nrm((ADIM, ADIM), s) for _ in range(ELAYERS)])
    p["o_b"] = jnp.zeros((ELAYERS, 1, ADIM), F32)
    p["ff_w1"] = jnp.stack([nrm((ADIM, EUNITS), s) for _ in range(ELAYERS)])
    p["ff_b1"] = jnp.zeros((ELAYERS, 1, EUNITS), F32)
    p["ff_w2"] = jnp.stack([nrm((EUNITS, ADIM), 1.0 / math.sqrt(EUNITS)) for _ in range(ELAYERS)])
    p["ff_b2"] = jnp.zeros((ELAYERS, 1, ADIM), F32)
    p["ln1_g"] = jnp.ones((ELAYERS, 1, ADIM), F32)
    p["ln1_b"] = jnp.zeros((ELAYERS, 1, ADIM), F32)
    p["ln2_g"] = jnp.ones((ELAYERS, 1, ADIM), F32)
    p["ln2_b"] = jnp.zeros((ELAYERS, 1, ADIM), F32)
    return p

# ----------------------------- CTC loss (DP in plain JAX) ----------------------

def ctc_loss(log_probs, hlens, labels, olens, blank=0):
    # log_probs: (B, T, V) from the fused encoder kernel; sequential DP stays in JAX.
    B, T, _ = log_probs.shape
    U = labels.shape[1]
    S = 2 * U + 1
    labels = jnp.where(labels < 0, 0, labels)
    ext = jnp.full((B, S), blank, dtype=jnp.int32).at[:, 1::2].set(labels)
    ext_lp = jnp.take_along_axis(log_probs, ext[:, None, :], axis=2)   # (B, T, S)
    ext_lp_t = ext_lp.transpose(1, 0, 2)                               # (T, B, S)

    same2 = jnp.concatenate([jnp.ones((B, 2), jnp.bool_), ext[:, 2:] == ext[:, :-2]], axis=1)
    allow_skip = (ext != blank) & (~same2)
    valid_s = jnp.arange(S)[None, :] < (2 * olens[:, None] + 1)

    a0 = jnp.full((B, S), NEG, F32)
    a0 = a0.at[:, 0].set(ext_lp[:, 0, 0])
    a0 = a0.at[:, 1].set(jnp.where(olens > 0, ext_lp[:, 0, 1], NEG))
    a0 = jnp.where(valid_s, a0, NEG)

    def lse3(a, b_, c_):
        m = jnp.maximum(jnp.maximum(a, b_), c_)
        return m + jnp.log(jnp.exp(a - m) + jnp.exp(b_ - m) + jnp.exp(c_ - m))

    def step(alpha, lp_t):
        a1 = alpha
        a2 = jnp.concatenate([jnp.full((B, 1), NEG, F32), alpha[:, :-1]], axis=1)
        a3 = jnp.concatenate([jnp.full((B, 2), NEG, F32), alpha[:, :-2]], axis=1)
        a3 = jnp.where(allow_skip, a3, NEG)
        new = lse3(a1, a2, a3) + lp_t
        new = jnp.where(valid_s, new, NEG)
        return new, new

    _, rest = jax.lax.scan(step, a0, ext_lp_t[1:])
    alphas = jnp.concatenate([a0[None], rest], axis=0)                 # (T, B, S)
    a_last = alphas[hlens - 1, jnp.arange(B), :]                       # (B, S)
    e1 = jnp.take_along_axis(a_last, (2 * olens)[:, None], axis=1)[:, 0]
    e2 = jnp.take_along_axis(a_last, jnp.maximum(2 * olens - 1, 0)[:, None], axis=1)[:, 0]
    e2 = jnp.where(olens > 0, e2, NEG)
    m = jnp.maximum(e1, e2)
    ll = m + jnp.log(jnp.exp(e1 - m) + jnp.exp(e2 - m))
    return jnp.mean(-ll)

# ----------------------------- E2E forward -------------------------------------

def e2e_forward(p, xs_pad, ilens, ys_pad):
    ilens = jnp.asarray(ilens, jnp.int32)
    tmax = int(np.max(np.asarray(ilens)))
    xs_pad = xs_pad[:, :tmax]
    B = xs_pad.shape[0]
    src_mask = (jnp.arange(tmax)[None, :] < ilens[:, None])[:, None, :]   # (B,1,T)

    # Encoder + CTC log-softmax in ONE fused Pallas kernel (plus 2 conv matmul kernels).
    hs_pad, log_probs, _hs_mask = encoder_ctc(p, xs_pad, src_mask)
    T2 = hs_pad.shape[1]
    hlens = jnp.minimum(ilens // 4, T2)   # spec uses ilens//4; clamp to encoder length

    olens = jnp.sum(ys_pad != IGNORE_ID, axis=1)
    loss_ctc = ctc_loss(log_probs, hlens, ys_pad, olens, blank=BLANK)

    # Attention decoder branch (single fused kernel over the whole time loop).
    loss_att, acc = decoder(p, hs_pad, hlens, ys_pad)

    # TODO(synk): cer_ctc / CER / WER (editdistance over char_list strings), Reporter
    # logging and beam-search recognize have no Pallas equivalent; omitted.
    loss = MTLALPHA * loss_ctc + (1.0 - MTLALPHA) * loss_att
    return loss, loss_ctc, loss_att, acc


if __name__ == "__main__":
    key = jax.random.PRNGKey(0)
    pkey, xkey = jax.random.split(key)
    params = init_params(pkey)

    B, TMAX = 2, 16
    xs_pad = jax.random.normal(xkey, (B, TMAX, IDIM), F32)
    ilens = np.array([16, 12], dtype=np.int32)
    ys_pad = jnp.array([[3, 5, 2, -1],
                        [6, 1, -1, -1]], dtype=jnp.int32)

    loss, loss_ctc, loss_att, acc = e2e_forward(params, xs_pad, ilens, ys_pad)
    jax.block_until_ready(loss)
    assert np.isfinite(float(loss)), (float(loss_ctc), float(loss_att))
    print("KERNEL_OK")
</pallas_src>

<mosaic_0001>
module attributes {stable_mosaic.version = 11 : i64} {
  func.func @_linear_kernel(%arg0: memref<126x9xf32, #tpu.memory_space<vmem>>, %arg1: memref<9x32xf32, #tpu.memory_space<vmem>>, %arg2: memref<1x32xf32, #tpu.memory_space<vmem>>, %arg3: memref<126x32xf32, #tpu.memory_space<vmem>>) attributes {dimension_semantics = [], scalar_prefetch = 0 : i64, scratch_operands = 0 : i64, tpu.core_type = #tpu.core_type<tc>} {
    %c0 = arith.constant 0 : index
    %c0_0 = arith.constant 0 : index
    %0 = vector.load %arg0[%c0, %c0_0] : memref<126x9xf32, #tpu.memory_space<vmem>>, vector<126x9xf32>
    %c0_1 = arith.constant 0 : index
    %c0_2 = arith.constant 0 : index
    %1 = vector.load %arg1[%c0_1, %c0_2] : memref<9x32xf32, #tpu.memory_space<vmem>>, vector<9x32xf32>
    %cst = arith.constant dense<0.000000e+00> : vector<126x32xf32>
    %2 = tpu.matmul %0, %1, %cst {dimension_numbers = #tpu.dot_dimension_numbers<[1], [0], [0], [1], [0, 0, 1, 1], [], []>} : vector<126x9xf32>, vector<9x32xf32>, vector<126x32xf32> -> vector<126x32xf32>
    %c0_3 = arith.constant 0 : index
    %c0_4 = arith.constant 0 : index
    %3 = vector.load %arg2[%c0_3, %c0_4] : memref<1x32xf32, #tpu.memory_space<vmem>>, vector<1x32xf32>
    %4 = vector.broadcast %3 : vector<1x32xf32> to vector<126x32xf32>
    %5 = arith.addf %2, %4 : vector<126x32xf32>
    %cst_5 = arith.constant 0.000000e+00 : f32
    %6 = vector.broadcast %cst_5 : f32 to vector<126x32xf32>
    %7 = arith.maximumf %5, %6 : vector<126x32xf32>
    %c0_6 = arith.constant 0 : index
    %c0_7 = arith.constant 0 : index
    %8 = vector.load %arg3[%c0_6, %c0_7] : memref<126x32xf32, #tpu.memory_space<vmem>>, vector<126x32xf32>
    tpu.vector_store %arg3[%c0_6, %c0_7], %7 {strides = array<i32>} : memref<126x32xf32, #tpu.memory_space<vmem>>, vector<126x32xf32>,
    return
  }
}

</mosaic_0001>

<bundles_post_ra>
// kernel: tpu_custom_call.1
= control target key start
LH: loop header
LB: loop body
LE: loop exit
PB: predicated region body
PF: predicated region fallthrough
CT: control target
= control target key end

     0   :  { %vm88_vm0 = vcmask 1040384   ;;  %vm39_vm1 = vcmask 72704   ;;  %vm348_vm2 = vmmov 1   ;;  %vm253_vm4 = vcmask 261120   ;;  %s505_s1 = inlined_call_operand.vmem [shape: f32[9,32], index: 1, kind: input, shape index: {}]   ;;  %s506_s0 = inlined_call_operand.vmem [shape: f32[126,9], index: 0, kind: input, shape index: {}]   ;;  %s507_s2 = inlined_call_operand.vmem [shape: f32[1,32], index: 2, kind: input, shape index: {}]   ;;  %s508_s3 = inlined_call_operand.vmem [shape: f32[126,32], index: 3, kind: output, shape index: {}]  }
   0x1   :  { %v30_v0 = vld [vmem:[%s505_s1] sm:$0xff]  ;;  %v31_v1 = vld [vmem:[%s505_s1 + $0x8] sm:$0x1]  ;;  %vm340_vm3 = vmpackc.low %vm88_vm0, %vm348_vm2  ;;  %vm269_vm5 = vcmask 259072  }
   0x2   :  { %v339_v2 = vpack.c.bf16 %v31_v1, %v30_v0  ;;  %v14_v3 = vld [vmem:[%s506_s0] sm:$0xff]  ;;  %v15_v5 = vld [vmem:[%s506_s0 + $0x8] sm:$0xff]  ;;  %v16_v7 = vld [vmem:[%s506_s0 + $0x10] sm:$0xff] }
   0x3   :  { %v22_v4 = vld [vmem:[%s506_s0 + $0x40] sm:$0xff]  ;;  %315 = vmatprep.mubr.msk.f32.mxu0 %vm39_vm1, %v14_v3  ;;  %v23_v6 = vld [vmem:[%s506_s0 + $0x48] sm:$0xff]  ;;  %v24_v8 = vld [vmem:[%s506_s0 + $0x50] sm:$0xff] }
   0x4   :  { %327 = vmatprep.mubr.msk.f32.mxu1 %vm39_vm1, %v22_v4  ;;  %341 = vmatprep.subr.msk.bf16.mxu0 %vm340_vm3, %v339_v2  ;;  %v17_v9 = vld [vmem:[%s506_s0 + $0x18] sm:$0xff]  ;;  %v18_v11 = vld [vmem:[%s506_s0 + $0x20] sm:$0xff]  ;;  %v19_v13 = vld [vmem:[%s506_s0 + $0x28] sm:$0xff] }
   0x5   :  { %345 = vmatprep.subr.msk.bf16.mxu1 %vm340_vm3, %v339_v2  ;;  %344 = vmatpush3.bf16.msk.msra.mxu0 %vm340_vm3, %v339_v2  ;;  %v25_v10 = vld [vmem:[%s506_s0 + $0x58] sm:$0xff]  ;;  %v26_v12 = vld [vmem:[%s506_s0 + $0x60] sm:$0xff]  ;;  %v27_v14 = vld [vmem:[%s506_s0 + $0x68] sm:$0xff] }
   0x6   :  { %346 = vmatpush3.bf16.msk.msra.mxu1 %vm340_vm3, %v339_v2  ;;  %v20_v15 = vld [vmem:[%s506_s0 + $0x30] sm:$0xff]  ;;  %v21_v17 = vld [vmem:[%s506_s0 + $0x38] sm:$0xff]  ;;  %v275_v19 = vld [vmem:[%s507_s2] ss:$0 sm:$0xff] }
   0x7   :  { %v28_v16 = vld [vmem:[%s506_s0 + $0x70] sm:$0xff]  ;;  %v29_v18 = vld [vmem:[%s506_s0 + $0x78] sm:$0x3f] }
   0x8   :  { %316 = vmatmul.mubr.msk.f32.vlgmr.msra.gmra.mrb[0].mxu0 %vm39_vm1, %v15_v5 }
   0x9   :  { %328 = vmatmul.mubr.msk.f32.vlgmr.msra.gmra.mrb[0].mxu1 %vm39_vm1, %v23_v6  ;;  %318 = vmatprep.mubr.msk.f32.mxu0 %vm39_vm1, %v16_v7 }
   0xa   :  { %330 = vmatprep.mubr.msk.f32.mxu1 %vm39_vm1, %v24_v8 }
   0xc   :  { %319 = vmatmul.mubr.msk.f32.gmra.mrb[2].mxu0 %vm39_vm1, %v17_v9 }
   0xd   :  { %331 = vmatmul.mubr.msk.f32.gmra.mrb[2].mxu1 %vm39_vm1, %v25_v10  ;;  %321 = vmatprep.mubr.msk.f32.mxu0 %vm39_vm1, %v18_v11 }
   0xe   :  { %333 = vmatprep.mubr.msk.f32.mxu1 %vm39_vm1, %v26_v12 }
  0x10   :  { %322 = vmatmul.mubr.msk.f32.gmra.mrb[4].mxu0 %vm39_vm1, %v19_v13 }
  0x11   :  { %334 = vmatmul.mubr.msk.f32.gmra.mrb[4].mxu1 %vm39_vm1, %v27_v14  ;;  %324 = vmatprep.mubr.msk.f32.mxu0 %vm39_vm1, %v20_v15 }
  0x12   :  { %336 = vmatprep.mubr.msk.f32.mxu1 %vm39_vm1, %v28_v16 }
  0x14   :  { %325 = vmatmul.mubr.msk.f32.gmra.mrb[6].mxu0 %vm39_vm1, %v21_v17 }
  0x15   :  { %337 = vmatmul.mubr.msk.f32.gmra.mrb[6].mxu1 %vm39_vm1, %v29_v18 }
  0xdb   :  { %v317_v20 = vpop.f32.mrb[0].mxu0 }
  0xdc   :  { %v329_v21 = vpop.f32.mrb[0].mxu1  ;;  %v164_v22 = vadd.f32 %v317_v20, %v275_v19  ;;  %v158_v24 = vpop.f32.mrb[1].mxu0 }
  0xdd   :  { %v204_v23 = vadd.f32 %v329_v21, %v275_v19  ;;  %v198_v25 = vpop.f32.mrb[1].mxu1  ;;  %v159_v26 = vadd.f32 %v275_v19, %v158_v24 }
  0xde   :  { %v199_v27 = vadd.f32 %v275_v19, %v198_v25  ;;  %v238_v28 = vmax.f32 %v164_v22, 0.0 }
  0xdf   :  { %v246_v29 = vmax.f32 %v204_v23, 0.0  ;;  %v237_v30 = vmax.f32 %v159_v26, 0.0  ;;  %v320_v32 = vpop.f32.mrb[2].mxu0 }
  0xe0   :  { %v245_v31 = vmax.f32 %v199_v27, 0.0  ;;  %v332_v33 = vpop.f32.mrb[2].mxu1  ;;  %255 = vst.msk [vmem:[%s508_s3 + $0x8] sm:$0xff] %vm253_vm4, %v238_v28  ;;  %v174_v34 = vadd.f32 %v320_v32, %v275_v19  ;;  %v168_v36 = vpop.f32.mrb[3].mxu0 }
  0xe1   :  { %263 = vst.msk [vmem:[%s508_s3 + $0x48] sm:$0xff] %vm253_vm4, %v246_v29  ;;  %v214_v35 = vadd.f32 %v332_v33, %v275_v19  ;;  %v208_v37 = vpop.f32.mrb[3].mxu1  ;;  %254 = vst.msk [vmem:[%s508_s3] sm:$0xff] %vm253_vm4, %v237_v30  ;;  %v169_v38 = vadd.f32 %v275_v19, %v168_v36 }
  0xe2   :  { %262 = vst.msk [vmem:[%s508_s3 + $0x40] sm:$0xff] %vm253_vm4, %v245_v31  ;;  %v209_v39 = vadd.f32 %v275_v19, %v208_v37  ;;  %v240_v40 = vmax.f32 %v174_v34, 0.0 }
  0xe3   :  { %v248_v41 = vmax.f32 %v214_v35, 0.0  ;;  %v239_v42 = vmax.f32 %v169_v38, 0.0  ;;  %v323_v44 = vpop.f32.mrb[4].mxu0 }
  0xe4   :  { %v247_v43 = vmax.f32 %v209_v39, 0.0  ;;  %v335_v45 = vpop.f32.mrb[4].mxu1  ;;  %257 = vst.msk [vmem:[%s508_s3 + $0x18] sm:$0xff] %vm253_vm4, %v240_v40  ;;  %v184_v46 = vadd.f32 %v323_v44, %v275_v19  ;;  %v178_v48 = vpop.f32.mrb[5].mxu0 }
  0xe5   :  { %265 = vst.msk [vmem:[%s508_s3 + $0x58] sm:$0xff] %vm253_vm4, %v248_v41  ;;  %v224_v47 = vadd.f32 %v335_v45, %v275_v19  ;;  %v218_v49 = vpop.f32.mrb[5].mxu1  ;;  %256 = vst.msk [vmem:[%s508_s3 + $0x10] sm:$0xff] %vm253_vm4, %v239_v42  ;;  %v179_v50 = vadd.f32 %v275_v19, %v178_v48 }
  0xe6   :  { %264 = vst.msk [vmem:[%s508_s3 + $0x50] sm:$0xff] %vm253_vm4, %v247_v43  ;;  %v219_v51 = vadd.f32 %v275_v19, %v218_v49  ;;  %v242_v52 = vmax.f32 %v184_v46, 0.0 }
  0xe7   :  { %v250_v53 = vmax.f32 %v224_v47, 0.0  ;;  %v241_v54 = vmax.f32 %v179_v50, 0.0  ;;  %v326_v56 = vpop.f32.mrb[6].mxu0 }
  0xe8   :  { %v249_v55 = vmax.f32 %v219_v51, 0.0  ;;  %v338_v57 = vpop.f32.mrb[6].mxu1  ;;  %259 = vst.msk [vmem:[%s508_s3 + $0x28] sm:$0xff] %vm253_vm4, %v242_v52  ;;  %v194_v58 = vadd.f32 %v326_v56, %v275_v19  ;;  %v188_v60 = vpop.f32.mrb[7].mxu0 }
  0xe9   :  { %267 = vst.msk [vmem:[%s508_s3 + $0x68] sm:$0xff] %vm253_vm4, %v250_v53  ;;  %v234_v59 = vadd.f32 %v338_v57, %v275_v19  ;;  %v228_v61 = vpop.f32.mrb[7].mxu1  ;;  %258 = vst.msk [vmem:[%s508_s3 + $0x20] sm:$0xff] %vm253_vm4, %v241_v54  ;;  %v189_v62 = vadd.f32 %v275_v19, %v188_v60 }
  0xea   :  { %266 = vst.msk [vmem:[%s508_s3 + $0x60] sm:$0xff] %vm253_vm4, %v249_v55  ;;  %v229_v63 = vadd.f32 %v275_v19, %v228_v61  ;;  %v244_v0 = vmax.f32 %v194_v58, 0.0 }
  0xeb   :  { %v252_v1 = vmax.f32 %v234_v59, 0.0  ;;  %v243_v2 = vmax.f32 %v189_v62, 0.0 }
  0xec   :  { %v251_v3 = vmax.f32 %v229_v63, 0.0  ;;  %261 = vst.msk [vmem:[%s508_s3 + $0x38] sm:$0xff] %vm253_vm4, %v244_v0 }
  0xed   :  { %270 = vst.msk [vmem:[%s508_s3 + $0x78] sm:$0x3f] %vm269_vm5, %v252_v1 }
  0xee   :  { %260 = vst.msk [vmem:[%s508_s3 + $0x30] sm:$0xff] %vm253_vm4, %v243_v2  ;;  %268 = vst.msk [vmem:[%s508_s3 + $0x70] sm:$0xff] %vm253_vm4, %v251_v3 }

</bundles_post_ra>
